<compile_context>
chip_gen: v7x
topology: tpu7x:2x2x1
jax: 0.10.0
libtpu: 0.0.40
codegen_flags: <defaults>
</compile_context>

<pallas_src>
import jax
import jax.numpy as jnp
from jax.experimental import pallas as pl
from jax.experimental.pallas import tpu as pltpu


def _swish_kernel(x_ref, o_ref):
    x = x_ref[...]
    xf = x.astype(jnp.float32)                      # no-op for f32 inputs
    o_ref[...] = (xf * jax.nn.sigmoid(xf)).astype(o_ref.dtype)


_LANE_CHOICES = (2048, 1024, 512, 256, 128)         # widest lane dim that divides n
_TARGET_BLOCK_BYTES = 4 * 1024 * 1024               # ~4 MiB per block
_SMALL_BYTES = 512 * 1024                           # single-block fast path threshold


def _swish_impl(x):
    if not jnp.issubdtype(x.dtype, jnp.floating):
        raise TypeError("swish expects a floating-point input")

    orig_shape = x.shape
    dtype = x.dtype
    n = x.size
    if n == 0:
        return x

    itemsize = jnp.dtype(dtype).itemsize
    nbytes = n * itemsize

    # --- Small-input fast path: whole array in VMEM, single invocation. ---
    if nbytes <= _SMALL_BYTES:
        xs = x if x.ndim >= 2 else x.reshape(1, n)
        out = pl.pallas_call(
            _swish_kernel,
            out_shape=jax.ShapeDtypeStruct(xs.shape, dtype),
        )(xs)
        return out.reshape(orig_shape)

    # --- Large path: lane-wide, multi-MiB blocks, copy-free when n % 128 == 0.
    x_flat = x.reshape(-1)
    pad = (-n) % 128
    if pad:
        # <=127 padded elements; swish(0) == 0 so padding is benign.
        x_flat = jnp.pad(x_flat, (0, pad))
    n_p = n + pad

    lane = 128
    for cand in _LANE_CHOICES:
        if n_p % cand == 0:
            lane = cand
            break
    rows = n_p // lane

    block_rows = _TARGET_BLOCK_BYTES // (lane * itemsize)
    block_rows = max(32, (block_rows // 32) * 32)    # sublane-friendly (f32/bf16)
    block_rows = min(block_rows, rows)               # == rows if array is one block

    grid = (pl.cdiv(rows, block_rows),)              # ragged last block is masked

    out2d = pl.pallas_call(
        _swish_kernel,
        out_shape=jax.ShapeDtypeStruct((rows, lane), dtype),
        grid_spec=pltpu.PrefetchScalarGridSpec(
            num_scalar_prefetch=0,
            grid=grid,
            in_specs=[pl.BlockSpec((block_rows, lane), lambda i: (i, 0))],
            out_specs=pl.BlockSpec((block_rows, lane), lambda i: (i, 0)),
        ),
        compiler_params=pltpu.CompilerParams(
            dimension_semantics=("parallel",),
            vmem_limit_bytes=32 * 1024 * 1024,
        ),
    )(x_flat.reshape(rows, lane))

    out_flat = out2d.reshape(-1)
    if pad:
        out_flat = out_flat[:n]
    return out_flat.reshape(orig_shape)


# jit the wrapper so the reshape plumbing compiles to bitcasts (no HBM copies).
swish = jax.jit(_swish_impl)


if __name__ == "__main__":
    key = jax.random.PRNGKey(0)
    k1, k2, k3 = jax.random.split(key, 3)

    # Small NCHW input consistent with Swish_Module usage (fast path).
    x_small = jax.random.normal(k1, (2, 4, 16, 16), dtype=jnp.float32)
    # Larger input exercising the tiled, lane-wide multi-block path.
    x_big = jax.random.normal(k2, (32, 64, 32, 32), dtype=jnp.float32)
    # Ragged element count (not a multiple of 128) exercising the minimal-pad path.
    x_ragged = jax.random.normal(k3, (3, 7, 61, 127), dtype=jnp.float32)

    for x in (x_small, x_big, x_ragged):
        out = jax.block_until_ready(swish(x))
        ref = x * jax.nn.sigmoid(x)
        assert out.shape == x.shape and out.dtype == x.dtype
        assert jnp.allclose(out, ref, atol=1e-5, rtol=1e-5)

    print("KERNEL_OK")
</pallas_src>

<mosaic_0001>
module attributes {stable_mosaic.version = 11 : i64} {
  func.func @_swish_kernel(%arg0: memref<2x4x16x16xf32, #tpu.memory_space<vmem>>, %arg1: memref<2x4x16x16xf32, #tpu.memory_space<vmem>>) attributes {dimension_semantics = [], scalar_prefetch = 0 : i64, scratch_operands = 0 : i64, tpu.core_type = #tpu.core_type<tc>} {
    %c0 = arith.constant 0 : index
    %c0_0 = arith.constant 0 : index
    %c0_1 = arith.constant 0 : index
    %c0_2 = arith.constant 0 : index
    %0 = vector.load %arg0[%c0, %c0_0, %c0_1, %c0_2] : memref<2x4x16x16xf32, #tpu.memory_space<vmem>>, vector<2x4x16x16xf32>
    %1 = arith.negf %0 : vector<2x4x16x16xf32>
    %2 = math.exp %1 : vector<2x4x16x16xf32>
    %cst = arith.constant 1.000000e+00 : f32
    %3 = vector.broadcast %cst : f32 to vector<2x4x16x16xf32>
    %4 = arith.addf %3, %2 : vector<2x4x16x16xf32>
    %5 = arith.divf %3, %4 : vector<2x4x16x16xf32>
    %6 = arith.mulf %0, %5 : vector<2x4x16x16xf32>
    %c0_3 = arith.constant 0 : index
    %c0_4 = arith.constant 0 : index
    %c0_5 = arith.constant 0 : index
    %c0_6 = arith.constant 0 : index
    %7 = vector.load %arg1[%c0_3, %c0_4, %c0_5, %c0_6] : memref<2x4x16x16xf32, #tpu.memory_space<vmem>>, vector<2x4x16x16xf32>
    tpu.vector_store %arg1[%c0_3, %c0_4, %c0_5, %c0_6], %6 {strides = array<i32>} : memref<2x4x16x16xf32, #tpu.memory_space<vmem>>, vector<2x4x16x16xf32>,
    return
  }
}

</mosaic_0001>

<bundles_post_ra>
// kernel: _swish_impl.1
= control target key start
LH: loop header
LB: loop body
LE: loop exit
PB: predicated region body
PF: predicated region fallthrough
CT: control target
= control target key end

     0   :  { %6 = vsyncpa [#allocation3], 0  ;;  %s441_s0 = inlined_call_operand.hbm [shape: f32[2,4,16,16], index: 0, kind: input, shape index: {}]   ;;  %s442_s1 = inlined_call_operand.hbm [shape: f32[2,4,16,16], index: 1, kind: output, shape index: {}]  }
   0x1   :  { %7 = vsyncpa [#allocation4], 0  ;;  %s317_s6 = smov [#allocation2]   ;;  %s269_s10 = scalar_lea.hbm %s441_s0, 2048 }
   0x2   :  { %s13_s7 = sshll.u32 %s317_s6, 4  ;;  %p270_p0 = scmp.ne.s32.totalorder %s441_s0, %s269_s10  ;;  %s14_s7 = int_to_ptr.vmem [resolvable:$true] %s13_s7 }
   0x3   :  { %p273_p1 = scmp.lt.u32.totalorder %s269_s10, %s441_s0 }
   0x5   :  { %p275_p2 = pnand %p273_p1, %p270_p0 }
   0x7   :  { %278 = shalt.err (!%p275_p2)
}
   0x8   :  { %s279_s15 = scalar_lea.vmem %s14_s7, 2048  ;;  %p284_p4 = scmp.lt.s32.totalorder %s14_s7, %s14_s7 }
   0x9   :  { %p280_p3 = scmp.ne.s32.totalorder %s14_s7, %s279_s15  ;;  %p285_p5 = scmp.lt.s32.totalorder %s279_s15, %s279_s15 }
   0xb   :  { %p286_p6 = por %p285_p5, %p284_p4 }
   0xd   :  { %p287_p7 = pnand %p286_p6, %p280_p3 }
   0xf   :  { %290 = shalt.err (!%p287_p7)
}
  0x10   :  { %s318_s16 = smov 128   ;;  %s319_s17 = smov 8  }
  0x11   :  { %19 = dma.hbm_to_vmem [thread:$0]  %s441_s0, 2048, %s14_s7, [#allocation3], %s318_s16, %s318_s16, %s319_s17  }
  0x12   :  { %313 = dma.done.wait [#allocation3], 2048  }
  0x13   :  { %314 = vsyncadd [#allocation3], 4294965248  ;;  %v346_v0 = vld [vmem:[#allocation2] sm:$0xff]  ;;  %v348_v1 = vld [vmem:[#allocation2 + $0x8] sm:$0xff]  ;;  %vm151_vm0 = vcmask 130048   ;;  %s320_s0 = smov [#allocation5]  }
  0x14   :  { %v350_v2 = vld [vmem:[#allocation2 + $0x10] sm:$0xff]  ;;  %v185_v3 = vmul.f32 -1.442695, %v346_v0  ;;  %v186_v4 = vmul.f32 -1.442695, %v348_v1  ;;  %v355_v6 = vld [vmem:[#allocation2 + $0x18] sm:$0xff] }
  0x15   :  { %v187_v5 = vmul.f32 -1.442695, %v350_v2  ;;  %v357_v7 = vld [vmem:[#allocation2 + $0x20] sm:$0xff]  ;;  %v359_v8 = vld [vmem:[#allocation2 + $0x28] sm:$0xff]  ;;  %v188_v9 = vmul.f32 -1.442695, %v355_v6 }
  0x16   :  { %205 = vpow2.f32 %v185_v3  ;;  %v189_v10 = vmul.f32 -1.442695, %v357_v7  ;;  %v190_v11 = vmul.f32 -1.442695, %v359_v8  ;;  %v364_v12 = vld [vmem:[#allocation2 + $0x30] sm:$0xff]  ;;  %v366_v13 = vld [vmem:[#allocation2 + $0x38] sm:$0xff] }
  0x17   :  { %207 = vpow2.f32 %v186_v4  ;;  %v368_v14 = vld [vmem:[#allocation2 + $0x40] sm:$0xff]  ;;  %v191_v15 = vmul.f32 -1.442695, %v364_v12  ;;  %v192_v16 = vmul.f32 -1.442695, %v366_v13  ;;  %v372_v17 = vld [vmem:[#allocation2 + $0x48] sm:$0xff] }
  0x18   :  { %209 = vpow2.f32 %v187_v5  ;;  %v374_v18 = vld [vmem:[#allocation2 + $0x50] sm:$0xff]  ;;  %v193_v19 = vmul.f32 -1.442695, %v368_v14  ;;  %v377_v20 = vld [vmem:[#allocation2 + $0x58] sm:$0xff]  ;;  %v194_v21 = vmul.f32 -1.442695, %v372_v17 }
  0x19   :  { %211 = vpow2.f32 %v188_v9  ;;  %v380_v22 = vld [vmem:[#allocation2 + $0x60] sm:$0xff]  ;;  %v195_v23 = vmul.f32 -1.442695, %v374_v18  ;;  %v196_v24 = vmul.f32 -1.442695, %v377_v20  ;;  %v385_v45 = vld [vmem:[#allocation2 + $0x68] sm:$0xff] }
  0x1a   :  { %213 = vpow2.f32 %v189_v10  ;;  %v197_v25 = vmul.f32 -1.442695, %v380_v22  ;;  %v387_v48 = vld [vmem:[#allocation2 + $0x70] sm:$0xff]  ;;  %v389_v51 = vld [vmem:[#allocation2 + $0x78] sm:$0xff]  ;;  %v198_v54 = vmul.f32 -1.442695, %v385_v45 }
  0x1b   :  { %215 = vpow2.f32 %v190_v11  ;;  %v199_v57 = vmul.f32 -1.442695, %v387_v48  ;;  %v200_v60 = vmul.f32 -1.442695, %v389_v51  ;;  %s173_s20 = sshll.u32 %s320_s0, 4  ;;  %s174_s20 = int_to_ptr.vmem [resolvable:$true] %s173_s20 }
  0x1c   :  { %217 = vpow2.f32 %v191_v15  ;;  %s291_s21 = scalar_lea.vmem %s174_s20, 2048  ;;  %p296_p9 = scmp.lt.s32.totalorder %s174_s20, %s174_s20 }
  0x1d   :  { %219 = vpow2.f32 %v192_v16  ;;  %p292_p8 = scmp.ne.s32.totalorder %s174_s20, %s291_s21  ;;  %p297_p10 = scmp.lt.s32.totalorder %s291_s21, %s291_s21 }
  0x1e   :  { %221 = vpow2.f32 %v193_v19 }
  0x1f   :  { %223 = vpow2.f32 %v194_v21  ;;  %p298_p11 = por %p297_p10, %p296_p9 }
  0x20   :  { %v206_v26 = vpop.eup %205  ;;  %225 = vpow2.f32 %v195_v23 }
  0x21   :  { %v208_v27 = vpop.eup %207  ;;  %v87_v28 = vadd.f32 1.0, %v206_v26  ;;  %227 = vpow2.f32 %v196_v24  ;;  %p299_p12 = pnand %p298_p11, %p292_p8 }
  0x22   :  { %v210_v29 = vpop.eup %209  ;;  %v88_v30 = vadd.f32 1.0, %v208_v27  ;;  %229 = vpow2.f32 %v197_v25 }
  0x23   :  { %v212_v31 = vpop.eup %211  ;;  %231 = vrcp.f32 %v87_v28  ;;  %v89_v32 = vadd.f32 1.0, %v210_v29 }
  0x24   :  { %v214_v33 = vpop.eup %213  ;;  %233 = vrcp.f32 %v88_v30  ;;  %v90_v34 = vadd.f32 1.0, %v212_v31 }
  0x25   :  { %v216_v35 = vpop.eup %215  ;;  %235 = vrcp.f32 %v89_v32  ;;  %v91_v36 = vadd.f32 1.0, %v214_v33 }
  0x26   :  { %v218_v37 = vpop.eup %217  ;;  %237 = vrcp.f32 %v90_v34  ;;  %v92_v38 = vadd.f32 1.0, %v216_v35 }
  0x27   :  { %v220_v39 = vpop.eup %219  ;;  %239 = vrcp.f32 %v91_v36  ;;  %v93_v40 = vadd.f32 1.0, %v218_v37 }
  0x28   :  { %v222_v41 = vpop.eup %221  ;;  %241 = vrcp.f32 %v92_v38  ;;  %v94_v42 = vadd.f32 1.0, %v220_v39 }
  0x29   :  { %v224_v43 = vpop.eup %223  ;;  %243 = vrcp.f32 %v93_v40  ;;  %v95_v44 = vadd.f32 1.0, %v222_v41 }
  0x2a   :  { %v226_v46 = vpop.eup %225  ;;  %245 = vrcp.f32 %v94_v42  ;;  %v96_v47 = vadd.f32 1.0, %v224_v43 }
  0x2b   :  { %v228_v49 = vpop.eup %227  ;;  %247 = vrcp.f32 %v95_v44  ;;  %v97_v50 = vadd.f32 1.0, %v226_v46 }
  0x2c   :  { %v230_v52 = vpop.eup %229  ;;  %249 = vrcp.f32 %v96_v47  ;;  %v98_v53 = vadd.f32 1.0, %v228_v49 }
  0x2d   :  { %v232_v55 = vpop.eup %231  ;;  %251 = vrcp.f32 %v97_v50  ;;  %v99_v56 = vadd.f32 1.0, %v230_v52 }
  0x2e   :  { %v234_v58 = vpop.eup %233  ;;  %v135_v59 = vmul.f32 %v232_v55, %v346_v0  ;;  %253 = vrcp.f32 %v98_v53 }
  0x2f   :  { %v236_v61 = vpop.eup %235  ;;  %v136_v62 = vmul.f32 %v234_v58, %v348_v1  ;;  %255 = vrcp.f32 %v99_v56 }
  0x30   :  { %v238_v63 = vpop.eup %237  ;;  %152 = vst.msk [vmem:[#allocation5] sm:$0xff] %vm151_vm0, %v135_v59  ;;  %v137_v3 = vmul.f32 %v236_v61, %v350_v2  ;;  %257 = vpow2.f32 %v198_v54 }
  0x31   :  { %v240_v4 = vpop.eup %239  ;;  %153 = vst.msk [vmem:[#allocation5 + $0x8] sm:$0xff] %vm151_vm0, %v136_v62  ;;  %v138_v5 = vmul.f32 %v238_v63, %v355_v6  ;;  %259 = vpow2.f32 %v199_v57 }
  0x32   :  { %v242_v0 = vpop.eup %241  ;;  %154 = vst.msk [vmem:[#allocation5 + $0x10] sm:$0xff] %vm151_vm0, %v137_v3  ;;  %v139_v9 = vmul.f32 %v240_v4, %v357_v7  ;;  %261 = vpow2.f32 %v200_v60 }
  0x33   :  { %v244_v1 = vpop.eup %243  ;;  %155 = vst.msk [vmem:[#allocation5 + $0x18] sm:$0xff] %vm151_vm0, %v138_v5  ;;  %v140_v10 = vmul.f32 %v242_v0, %v359_v8 }
  0x34   :  { %v246_v11 = vpop.eup %245  ;;  %156 = vst.msk [vmem:[#allocation5 + $0x20] sm:$0xff] %vm151_vm0, %v139_v9  ;;  %v141_v2 = vmul.f32 %v244_v1, %v364_v12 }
  0x35   :  { %v248_v15 = vpop.eup %247  ;;  %157 = vst.msk [vmem:[#allocation5 + $0x28] sm:$0xff] %vm151_vm0, %v140_v10  ;;  %v142_v6 = vmul.f32 %v246_v11, %v366_v13 }
  0x36   :  { %v250_v16 = vpop.eup %249  ;;  %158 = vst.msk [vmem:[#allocation5 + $0x30] sm:$0xff] %vm151_vm0, %v141_v2  ;;  %v143_v7 = vmul.f32 %v248_v15, %v368_v14 }
  0x37   :  { %v252_v19 = vpop.eup %251  ;;  %159 = vst.msk [vmem:[#allocation5 + $0x38] sm:$0xff] %vm151_vm0, %v142_v6  ;;  %v144_v8 = vmul.f32 %v250_v16, %v372_v17 }
  0x38   :  { %v254_v21 = vpop.eup %253  ;;  %160 = vst.msk [vmem:[#allocation5 + $0x40] sm:$0xff] %vm151_vm0, %v143_v7  ;;  %v145_v12 = vmul.f32 %v252_v19, %v374_v18 }
  0x39   :  { %v256_v23 = vpop.eup %255  ;;  %161 = vst.msk [vmem:[#allocation5 + $0x48] sm:$0xff] %vm151_vm0, %v144_v8  ;;  %v146_v13 = vmul.f32 %v254_v21, %v377_v20 }
  0x3a   :  { %v258_v24 = vpop.eup %257  ;;  %162 = vst.msk [vmem:[#allocation5 + $0x50] sm:$0xff] %vm151_vm0, %v145_v12  ;;  %v147_v14 = vmul.f32 %v256_v23, %v380_v22 }
  0x3b   :  { %v260_v25 = vpop.eup %259  ;;  %163 = vst.msk [vmem:[#allocation5 + $0x58] sm:$0xff] %vm151_vm0, %v146_v13  ;;  %v100_v26 = vadd.f32 1.0, %v258_v24 }
  0x3c   :  { %v262_v17 = vpop.eup %261  ;;  %164 = vst.msk [vmem:[#allocation5 + $0x60] sm:$0xff] %vm151_vm0, %v147_v14  ;;  %v101_v27 = vadd.f32 1.0, %v260_v25 }
  0x3d   :  { %263 = vrcp.f32 %v100_v26  ;;  %v102_v18 = vadd.f32 1.0, %v262_v17 }
  0x3e   :  { %265 = vrcp.f32 %v101_v27 }
  0x3f   :  { %267 = vrcp.f32 %v102_v18 }
  0x47   :  { %v264_v28 = vpop.eup %263 }
  0x48   :  { %v266_v20 = vpop.eup %265  ;;  %v148_v29 = vmul.f32 %v264_v28, %v385_v45 }
  0x49   :  { %v268_v30 = vpop.eup %267  ;;  %v149_v22 = vmul.f32 %v266_v20, %v387_v48 }
  0x4a   :  { %165 = vst.msk [vmem:[#allocation5 + $0x68] sm:$0xff] %vm151_vm0, %v148_v29  ;;  %v150_v31 = vmul.f32 %v268_v30, %v389_v51 }
  0x4b   :  { %166 = vst.msk [vmem:[#allocation5 + $0x70] sm:$0xff] %vm151_vm0, %v149_v22 }
  0x4c   :  { %167 = vst.msk [vmem:[#allocation5 + $0x78] sm:$0xff] %vm151_vm0, %v150_v31 }
  0x4d   :  { %302 = shalt.err (!%p299_p12)
}
  0x4e   :  { %s303_s24 = scalar_lea.hbm %s442_s1, 2048 }
  0x4f   :  { %p304_p13 = scmp.ne.s32.totalorder %s442_s1, %s303_s24  ;;  %p307_p0 = scmp.lt.u32.totalorder %s303_s24, %s442_s1 }
  0x51   :  { %p309_p1 = pnand %p307_p0, %p304_p13 }
  0x53   :  { %312 = shalt.err (!%p309_p1)
}
  0x54   :  { %179 = dma.vmem_to_hbm [thread:$0]  %s174_s20, 2048, %s442_s1, [#allocation4], %s318_s16, %s318_s16, %s319_s17  }
  0x55   :  { %315 = dma.done.wait [#allocation4], 2048  }
  0x56   :  { %316 = vsyncadd [#allocation4], 4294965248 }
  0x57   :  { %183 = vsyncpa [#allocation3], 1 }
  0x58   :  { %184 = vsyncpa [#allocation4], 1 }

</bundles_post_ra>
